<compile_context>
chip_gen: v6e
topology: v6e:2x2x1
jax: 0.10.0
libtpu: 0.0.40
codegen_flags: <defaults>
</compile_context>

<pallas_src>
import functools

import jax
import jax.numpy as jnp
from jax import lax
from jax.experimental import pallas as pl
from jax.experimental.pallas import tpu as pltpu

EPS = 1e-5


# ----------------------------------------------------------------------------
# Kernels
# ----------------------------------------------------------------------------
def _complex_bn1d_3d_kernel(xr_ref, xi_ref, p_ref, or_ref, oi_ref, *, eps):
    """(N, c_tile, L) tiles, channels on sublanes, L on lanes.

    xr_ref / xi_ref : (N, c_tile, L) input tiles (full N and L, tiled over C)
    p_ref           : (C, 4) resident packed params [g_r, b_r, g_i, b_i]
    or_ref / oi_ref : (N, c_tile, L) outputs
    """
    n, ct, l = xr_ref.shape
    inv_count = jnp.float32(1.0 / (n * l))
    unroll = True if n <= 16 else 8

    # Slice this tile's rows out of the resident param block.
    if ct == p_ref.shape[0]:            # grid of 1 -> whole array
        p = p_ref[...].astype(jnp.float32)
    else:                               # c_tile is a multiple of 8 here
        c_start = pl.multiple_of(pl.program_id(0) * ct, 8)
        p = p_ref[pl.ds(c_start, ct), :].astype(jnp.float32)

    def _bn(x_ref, o_ref, g_col, b_col):
        zero = jnp.zeros((ct, l), jnp.float32)

        # Pass 1 (VMEM-only): per-channel sum -> mean.  Per-N slices keep the
        # live f32 footprint at one (c_tile, L) slab instead of the full block.
        def sum_body(i, s):
            return s + x_ref[i].astype(jnp.float32)

        s = lax.fori_loop(0, n, sum_body, zero, unroll=unroll)
        mean = jnp.sum(s, axis=-1, keepdims=True) * inv_count        # (ct, 1)

        # Pass 2 (VMEM-only): centered sum-of-squares -> biased variance
        # (numerically safer than E[x^2] - mean^2; no extra HBM traffic).
        def var_body(i, ss):
            d = x_ref[i].astype(jnp.float32) - mean
            return ss + d * d

        ss = lax.fori_loop(0, n, var_body, zero, unroll=unroll)
        var = jnp.sum(ss, axis=-1, keepdims=True) * inv_count        # (ct, 1)

        inv = lax.rsqrt(var + jnp.float32(eps))
        gamma = p[:, g_col:g_col + 1]                                # (ct, 1)
        beta = p[:, b_col:b_col + 1]                                 # (ct, 1)
        scale = inv * gamma                                          # (ct, 1)
        shift = beta - mean * scale                                  # (ct, 1)

        # Pass 3: normalize + affine, per-N slices, lane-dense stores.
        def norm_body(i, carry):
            x = x_ref[i].astype(jnp.float32)
            o_ref[i] = (x * scale + shift).astype(o_ref.dtype)
            return carry

        lax.fori_loop(0, n, norm_body, 0, unroll=unroll)

    _bn(xr_ref, or_ref, 0, 1)
    _bn(xi_ref, oi_ref, 2, 3)


def _complex_bn1d_2d_kernel(xr_ref, xi_ref, p_ref, or_ref, oi_ref, *, eps):
    """(N, c_tile) tiles, channels on the lane axis (lane-dense 2D path).

    xr_ref / xi_ref : (N, c_tile) input tiles (full N, tiled over C)
    p_ref           : (4, C) resident packed params [g_r; b_r; g_i; b_i]
    or_ref / oi_ref : (N, c_tile) outputs
    """
    n, ct = xr_ref.shape
    inv_count = jnp.float32(1.0 / n)

    if ct == p_ref.shape[1]:            # grid of 1 -> whole array
        p = p_ref[...].astype(jnp.float32)
    else:                               # c_tile is a multiple of 128 here
        c_start = pl.multiple_of(pl.program_id(0) * ct, 128)
        p = p_ref[:, pl.ds(c_start, ct)].astype(jnp.float32)

    def _bn(x_ref, o_ref, g_row, b_row):
        x = x_ref[...].astype(jnp.float32)                           # (n, ct)
        mean = jnp.sum(x, axis=0, keepdims=True) * inv_count         # (1, ct)
        d = x - mean
        var = jnp.sum(d * d, axis=0, keepdims=True) * inv_count      # (1, ct)
        inv = lax.rsqrt(var + jnp.float32(eps))
        gamma = p[g_row:g_row + 1, :]                                # (1, ct)
        beta = p[b_row:b_row + 1, :]                                 # (1, ct)
        scale = inv * gamma
        shift = beta - mean * scale
        o_ref[...] = (x * scale + shift).astype(o_ref.dtype)

    _bn(xr_ref, or_ref, 0, 1)
    _bn(xi_ref, oi_ref, 2, 3)


# ----------------------------------------------------------------------------
# Generation-aware sizing helpers
# ----------------------------------------------------------------------------
def _chip_config():
    """Return (vmem_capacity_bytes, tensorcores_per_chip estimate)."""
    vmem_cap = 128 * 1024 * 1024
    try:
        info = pltpu.get_tpu_info()
        vmem_cap = int(getattr(info, "vmem_capacity_bytes", vmem_cap))
    except Exception:
        pass
    # v7x is the only generation with a 64 MiB per-TC VMEM (and 2 TCs/chip);
    # v5e/v6e have 128 MiB and a single TC.
    cores = 2 if vmem_cap <= 64 * 1024 * 1024 else 1
    return vmem_cap, cores


def _pick_c_tile(elems_per_channel, c, itemsize, align, budget_bytes, cores):
    """Channel tile: multiple of `align` (or full C) with block bytes within
    budget.  Multi-TC chips prefer >=2 grid steps per core with a
    core-divisible step count; single-TC chips take the largest fitting block
    (grid of 1 when the whole problem fits)."""
    cands = sorted({ct for ct in range(align, c + 1, align) if c % ct == 0}
                   | {c})
    within = [ct for ct in cands
              if elems_per_channel * ct * itemsize <= budget_bytes]
    if not within:
        # TODO(synk): streaming fallback; for now use the smallest legal tile.
        return min(cands)
    if cores >= 2:
        for min_steps in (2 * cores, cores):
            pref = [ct for ct in within
                    if (c // ct) >= min_steps and (c // ct) % cores == 0]
            if pref:
                return max(pref)
    return max(within)


def _vmem_limit(needed, soft_cap, phys_cap):
    limit = max(32 * 1024 * 1024, int(1.25 * needed))
    limit = min(limit, soft_cap)
    if needed > limit:
        # Oversized single block (no streaming fallback yet): allow up to
        # physical VMEM minus headroom so Mosaic can still attempt it.
        limit = min(int(1.1 * needed) + (1 << 20), phys_cap - (4 << 20))
    return int(limit)


# ----------------------------------------------------------------------------
# pallas_call wrappers
# ----------------------------------------------------------------------------
def _run_3d(x_r, x_i, params, eps, block_budget, soft_cap, vmem_cap, cores):
    N, C, L = x_r.shape
    itemsize = jnp.dtype(x_r.dtype).itemsize
    c_tile = _pick_c_tile(N * L, C, itemsize, 8, block_budget, cores)
    grid = (C // c_tile,)

    block_bytes = N * c_tile * L * itemsize
    # 4 big blocks (xr, xi, or, oi) double-buffered + f32 stat partials
    # (two (c_tile, L) accumulators live at once) + resident packed params.
    vmem_needed = 2 * 4 * block_bytes + 2 * c_tile * L * 4 + params.size * 4
    vmem_limit = _vmem_limit(vmem_needed, soft_cap, vmem_cap)

    x_spec = pl.BlockSpec((N, c_tile, L), lambda c: (0, c, 0))
    # Resident params: full-array block, constant block index -> one DMA.
    p_spec = pl.BlockSpec((C, 4), lambda c: (0, 0))

    cost = pl.CostEstimate(
        flops=int(2 * 7 * x_r.size),
        transcendentals=int(2 * C),
        bytes_accessed=int(4 * x_r.size * itemsize + params.size * 4),
    )

    return pl.pallas_call(
        functools.partial(_complex_bn1d_3d_kernel, eps=float(eps)),
        out_shape=(
            jax.ShapeDtypeStruct((N, C, L), x_r.dtype),
            jax.ShapeDtypeStruct((N, C, L), x_i.dtype),
        ),
        grid=grid,
        in_specs=[x_spec, x_spec, p_spec],
        out_specs=(x_spec, x_spec),
        compiler_params=pltpu.CompilerParams(
            dimension_semantics=("parallel",),
            vmem_limit_bytes=vmem_limit,
        ),
        cost_estimate=cost,
    )(x_r, x_i, params)


def _run_2d(x_r, x_i, params, eps, block_budget, soft_cap, vmem_cap, cores):
    N, C = x_r.shape
    itemsize = jnp.dtype(x_r.dtype).itemsize
    # Lane axis = channels: tile must be a multiple of 128 or the full C.
    c_tile = _pick_c_tile(N, C, itemsize, 128, block_budget, cores)
    grid = (C // c_tile,)

    block_bytes = N * c_tile * itemsize
    # 4 blocks double-buffered + one live f32 copy of the block per part
    # + resident packed params.
    vmem_needed = 2 * 4 * block_bytes + 2 * N * c_tile * 4 + params.size * 4
    vmem_limit = _vmem_limit(vmem_needed, soft_cap, vmem_cap)

    x_spec = pl.BlockSpec((N, c_tile), lambda c: (0, c))
    p_spec = pl.BlockSpec((4, C), lambda c: (0, 0))   # resident

    cost = pl.CostEstimate(
        flops=int(2 * 7 * x_r.size),
        transcendentals=int(2 * C),
        bytes_accessed=int(4 * x_r.size * itemsize + params.size * 4),
    )

    return pl.pallas_call(
        functools.partial(_complex_bn1d_2d_kernel, eps=float(eps)),
        out_shape=(
            jax.ShapeDtypeStruct((N, C), x_r.dtype),
            jax.ShapeDtypeStruct((N, C), x_i.dtype),
        ),
        grid=grid,
        in_specs=[x_spec, x_spec, p_spec],
        out_specs=(x_spec, x_spec),
        compiler_params=pltpu.CompilerParams(
            dimension_semantics=("parallel",),
            vmem_limit_bytes=vmem_limit,
        ),
        cost_estimate=cost,
    )(x_r, x_i, params)


def naive_complex_batchnorm1d(x_r, x_i, gamma_r, beta_r, gamma_i, beta_i,
                              eps=EPS):
    """x_r, x_i: (N, C) or (N, C, L) float arrays. Returns (y_r, y_i)."""
    if x_r.shape != x_i.shape:
        raise ValueError("real and imaginary inputs must have the same shape")

    vmem_cap, cores = _chip_config()
    if cores >= 2:
        # v7x-like: 64 MiB VMEM / 2 TCs -> ~4 MiB blocks (~32 MiB resident).
        block_budget, soft_cap = 4 << 20, 56 << 20
    else:
        # v5e / v6e: 128 MiB VMEM / 1 TC -> ~8 MiB blocks (~64 MiB resident).
        block_budget, soft_cap = 8 << 20, 96 << 20

    if x_r.ndim == 2:
        # Lane-dense 2D path: channels on lanes, no (N, C, 1) expansion.
        params = jnp.stack([gamma_r, beta_r, gamma_i, beta_i],
                           axis=0).astype(jnp.float32)               # (4, C)
        return _run_2d(x_r, x_i, params, eps, block_budget, soft_cap,
                       vmem_cap, cores)

    if x_r.ndim != 3:
        raise ValueError("expected (N, C) or (N, C, L) inputs")

    params = jnp.stack([gamma_r, beta_r, gamma_i, beta_i],
                       axis=-1).astype(jnp.float32)                  # (C, 4)
    return _run_3d(x_r, x_i, params, eps, block_budget, soft_cap,
                   vmem_cap, cores)


# ----------------------------------------------------------------------------
# Reference + test
# ----------------------------------------------------------------------------
def _reference_bn1d(x, gamma, beta, eps=EPS):
    axes = tuple(i for i in range(x.ndim) if i != 1)
    mean = jnp.mean(x, axis=axes, keepdims=True)
    var = jnp.mean((x - mean) ** 2, axis=axes, keepdims=True)
    shape = [1] * x.ndim
    shape[1] = -1
    g = gamma.reshape(shape)
    b = beta.reshape(shape)
    return (x - mean) / jnp.sqrt(var + eps) * g + b


if __name__ == "__main__":
    key = jax.random.PRNGKey(0)
    k_xr, k_xi, k_gr, k_br, k_gi, k_bi = jax.random.split(key, 6)

    # BatchNorm1d with a sequence dim: (N, C, L). L multiple of 128 keeps
    # lanes dense; C=16 exercises either grid=(1,) (single-TC chips) or a
    # balanced 2-step channel grid (v7x-like chips).
    N, C, L = 4, 16, 256
    x_r = jax.random.normal(k_xr, (N, C, L), dtype=jnp.float32)
    x_i = jax.random.normal(k_xi, (N, C, L), dtype=jnp.float32)

    gamma_r = 1.0 + 0.1 * jax.random.normal(k_gr, (C,), dtype=jnp.float32)
    beta_r = 0.1 * jax.random.normal(k_br, (C,), dtype=jnp.float32)
    gamma_i = 1.0 + 0.1 * jax.random.normal(k_gi, (C,), dtype=jnp.float32)
    beta_i = 0.1 * jax.random.normal(k_bi, (C,), dtype=jnp.float32)

    y_r, y_i = naive_complex_batchnorm1d(
        x_r, x_i, gamma_r, beta_r, gamma_i, beta_i)
    jax.block_until_ready((y_r, y_i))

    ref_r = _reference_bn1d(x_r, gamma_r, beta_r)
    ref_i = _reference_bn1d(x_i, gamma_i, beta_i)
    assert jnp.allclose(y_r, ref_r, atol=1e-4, rtol=1e-4), "real part mismatch"
    assert jnp.allclose(y_i, ref_i, atol=1e-4, rtol=1e-4), "imag part mismatch"

    # BatchNorm1d 2D path: (N, C) inputs, channels on the lane axis.
    x2_r = jax.random.normal(jax.random.PRNGKey(1), (8, C), dtype=jnp.float32)
    x2_i = jax.random.normal(jax.random.PRNGKey(2), (8, C), dtype=jnp.float32)
    y2_r, y2_i = naive_complex_batchnorm1d(
        x2_r, x2_i, gamma_r, beta_r, gamma_i, beta_i)
    jax.block_until_ready((y2_r, y2_i))

    ref2_r = _reference_bn1d(x2_r, gamma_r, beta_r)
    ref2_i = _reference_bn1d(x2_i, gamma_i, beta_i)
    assert jnp.allclose(y2_r, ref2_r, atol=1e-4, rtol=1e-4), "2D real mismatch"
    assert jnp.allclose(y2_i, ref2_i, atol=1e-4, rtol=1e-4), "2D imag mismatch"

    print("KERNEL_OK")
</pallas_src>

<mosaic_0001>
module attributes {stable_mosaic.version = 11 : i64} {
  func.func @_complex_bn1d_3d_kernel(%arg0: i32, %arg1: memref<4x16x256xf32, #tpu.memory_space<vmem>>, %arg2: memref<4x16x256xf32, #tpu.memory_space<vmem>>, %arg3: memref<16x4xf32, #tpu.memory_space<vmem>>, %arg4: memref<4x16x256xf32, #tpu.memory_space<vmem>>, %arg5: memref<4x16x256xf32, #tpu.memory_space<vmem>>) attributes {dimension_semantics = [#tpu.dimension_semantics<parallel>], iteration_bounds = array<i64: 1>, scalar_prefetch = 0 : i64, scratch_operands = 0 : i64, tpu.core_type = #tpu.core_type<tc>, window_params = [{transform_indices = @transform_0, window_bounds = array<i64: 4, 16, 256>}, {transform_indices = @transform_1, window_bounds = array<i64: 4, 16, 256>}, {pipeline_mode = #tpu.pipeline_mode<synchronous>, transform_indices = @transform_2, window_bounds = array<i64: 16, 4>}, {transform_indices = @transform_3, window_bounds = array<i64: 4, 16, 256>}, {transform_indices = @transform_4, window_bounds = array<i64: 4, 16, 256>}]} {
    %c0 = arith.constant 0 : index
    %c0_0 = arith.constant 0 : index
    %0 = vector.load %arg3[%c0, %c0_0] : memref<16x4xf32, #tpu.memory_space<vmem>>, vector<16x4xf32>
    %cst = arith.constant 0.000000e+00 : f32
    %1 = vector.broadcast %cst : f32 to vector<16x256xf32>
    %c0_i32 = arith.constant 0 : i32
    %2 = arith.index_cast %c0_i32 : i32 to index
    %c0_1 = arith.constant 0 : index
    %c0_2 = arith.constant 0 : index
    %3 = vector.load %arg1[%2, %c0_1, %c0_2] : memref<4x16x256xf32, #tpu.memory_space<vmem>>, vector<1x16x256xf32>
    %4 = vector.shape_cast %3 : vector<1x16x256xf32> to vector<16x256xf32>
    %5 = arith.addf %1, %4 : vector<16x256xf32>
    %c1_i32 = arith.constant 1 : i32
    %6 = arith.index_cast %c1_i32 : i32 to index
    %c0_3 = arith.constant 0 : index
    %c0_4 = arith.constant 0 : index
    %7 = vector.load %arg1[%6, %c0_3, %c0_4] : memref<4x16x256xf32, #tpu.memory_space<vmem>>, vector<1x16x256xf32>
    %8 = vector.shape_cast %7 : vector<1x16x256xf32> to vector<16x256xf32>
    %9 = arith.addf %5, %8 : vector<16x256xf32>
    %c2_i32 = arith.constant 2 : i32
    %10 = arith.index_cast %c2_i32 : i32 to index
    %c0_5 = arith.constant 0 : index
    %c0_6 = arith.constant 0 : index
    %11 = vector.load %arg1[%10, %c0_5, %c0_6] : memref<4x16x256xf32, #tpu.memory_space<vmem>>, vector<1x16x256xf32>
    %12 = vector.shape_cast %11 : vector<1x16x256xf32> to vector<16x256xf32>
    %13 = arith.addf %9, %12 : vector<16x256xf32>
    %c3_i32 = arith.constant 3 : i32
    %14 = arith.index_cast %c3_i32 : i32 to index
    %c0_7 = arith.constant 0 : index
    %c0_8 = arith.constant 0 : index
    %15 = vector.load %arg1[%14, %c0_7, %c0_8] : memref<4x16x256xf32, #tpu.memory_space<vmem>>, vector<1x16x256xf32>
    %16 = vector.shape_cast %15 : vector<1x16x256xf32> to vector<16x256xf32>
    %17 = arith.addf %13, %16 : vector<16x256xf32>
    %c4_i32 = arith.constant 4 : i32
    %cst_9 = arith.constant dense<0.000000e+00> : vector<16xf32>
    %18 = vector.multi_reduction <add>, %17, %cst_9 [1] : vector<16x256xf32> to vector<16xf32>
    %19 = vector.shape_cast %18 : vector<16xf32> to vector<16x1xf32>
    %cst_10 = arith.constant 9.765625E-4 : f32
    %20 = vector.broadcast %cst_10 : f32 to vector<16x1xf32>
    %21 = arith.mulf %19, %20 : vector<16x1xf32>
    %c0_i32_11 = arith.constant 0 : i32
    %22 = arith.index_cast %c0_i32_11 : i32 to index
    %c0_12 = arith.constant 0 : index
    %c0_13 = arith.constant 0 : index
    %23 = vector.load %arg1[%22, %c0_12, %c0_13] : memref<4x16x256xf32, #tpu.memory_space<vmem>>, vector<1x16x256xf32>
    %24 = vector.shape_cast %23 : vector<1x16x256xf32> to vector<16x256xf32>
    %25 = vector.broadcast %21 : vector<16x1xf32> to vector<16x256xf32>
    %26 = arith.subf %24, %25 : vector<16x256xf32>
    %27 = arith.mulf %26, %26 : vector<16x256xf32>
    %28 = arith.addf %1, %27 : vector<16x256xf32>
    %c1_i32_14 = arith.constant 1 : i32
    %29 = arith.index_cast %c1_i32_14 : i32 to index
    %c0_15 = arith.constant 0 : index
    %c0_16 = arith.constant 0 : index
    %30 = vector.load %arg1[%29, %c0_15, %c0_16] : memref<4x16x256xf32, #tpu.memory_space<vmem>>, vector<1x16x256xf32>
    %31 = vector.shape_cast %30 : vector<1x16x256xf32> to vector<16x256xf32>
    %32 = vector.broadcast %21 : vector<16x1xf32> to vector<16x256xf32>
    %33 = arith.subf %31, %32 : vector<16x256xf32>
    %34 = arith.mulf %33, %33 : vector<16x256xf32>
    %35 = arith.addf %28, %34 : vector<16x256xf32>
    %c2_i32_17 = arith.constant 2 : i32
    %36 = arith.index_cast %c2_i32_17 : i32 to index
    %c0_18 = arith.constant 0 : index
    %c0_19 = arith.constant 0 : index
    %37 = vector.load %arg1[%36, %c0_18, %c0_19] : memref<4x16x256xf32, #tpu.memory_space<vmem>>, vector<1x16x256xf32>
    %38 = vector.shape_cast %37 : vector<1x16x256xf32> to vector<16x256xf32>
    %39 = vector.broadcast %21 : vector<16x1xf32> to vector<16x256xf32>
    %40 = arith.subf %38, %39 : vector<16x256xf32>
    %41 = arith.mulf %40, %40 : vector<16x256xf32>
    %42 = arith.addf %35, %41 : vector<16x256xf32>
    %c3_i32_20 = arith.constant 3 : i32
    %43 = arith.index_cast %c3_i32_20 : i32 to index
    %c0_21 = arith.constant 0 : index
    %c0_22 = arith.constant 0 : index
    %44 = vector.load %arg1[%43, %c0_21, %c0_22] : memref<4x16x256xf32, #tpu.memory_space<vmem>>, vector<1x16x256xf32>
    %45 = vector.shape_cast %44 : vector<1x16x256xf32> to vector<16x256xf32>
    %46 = vector.broadcast %21 : vector<16x1xf32> to vector<16x256xf32>
    %47 = arith.subf %45, %46 : vector<16x256xf32>
    %48 = arith.mulf %47, %47 : vector<16x256xf32>
    %49 = arith.addf %42, %48 : vector<16x256xf32>
    %c4_i32_23 = arith.constant 4 : i32
    %cst_24 = arith.constant dense<0.000000e+00> : vector<16xf32>
    %50 = vector.multi_reduction <add>, %49, %cst_24 [1] : vector<16x256xf32> to vector<16xf32>
    %51 = vector.shape_cast %50 : vector<16xf32> to vector<16x1xf32>
    %cst_25 = arith.constant 9.765625E-4 : f32
    %52 = vector.broadcast %cst_25 : f32 to vector<16x1xf32>
    %53 = arith.mulf %51, %52 : vector<16x1xf32>
    %cst_26 = arith.constant 9.99999974E-6 : f32
    %54 = vector.broadcast %cst_26 : f32 to vector<16x1xf32>
    %55 = arith.addf %53, %54 : vector<16x1xf32>
    %56 = math.rsqrt %55 : vector<16x1xf32>
    %57 = vector.extract_strided_slice %0 {offsets = [0, 0], sizes = [16, 1], strides = [1, 1]} : vector<16x4xf32> to vector<16x1xf32>
    %58 = vector.extract_strided_slice %0 {offsets = [0, 1], sizes = [16, 1], strides = [1, 1]} : vector<16x4xf32> to vector<16x1xf32>
    %59 = arith.mulf %56, %57 : vector<16x1xf32>
    %60 = arith.mulf %21, %59 : vector<16x1xf32>
    %61 = arith.subf %58, %60 : vector<16x1xf32>
    %c0_i32_27 = arith.constant 0 : i32
    %62 = arith.index_cast %c0_i32_27 : i32 to index
    %c0_28 = arith.constant 0 : index
    %c0_29 = arith.constant 0 : index
    %63 = vector.load %arg1[%62, %c0_28, %c0_29] : memref<4x16x256xf32, #tpu.memory_space<vmem>>, vector<1x16x256xf32>
    %64 = vector.shape_cast %63 : vector<1x16x256xf32> to vector<16x256xf32>
    %65 = vector.broadcast %59 : vector<16x1xf32> to vector<16x256xf32>
    %66 = arith.mulf %64, %65 : vector<16x256xf32>
    %67 = vector.broadcast %61 : vector<16x1xf32> to vector<16x256xf32>
    %68 = arith.addf %66, %67 : vector<16x256xf32>
    %69 = arith.index_cast %c0_i32_27 : i32 to index
    %c0_30 = arith.constant 0 : index
    %c0_31 = arith.constant 0 : index
    %70 = vector.load %arg4[%69, %c0_30, %c0_31] : memref<4x16x256xf32, #tpu.memory_space<vmem>>, vector<1x16x256xf32>
    %71 = vector.shape_cast %70 : vector<1x16x256xf32> to vector<16x256xf32>
    %72 = vector.shape_cast %68 : vector<16x256xf32> to vector<1x16x256xf32>
    tpu.vector_store %arg4[%69, %c0_30, %c0_31], %72 {strides = array<i32>} : memref<4x16x256xf32, #tpu.memory_space<vmem>>, vector<1x16x256xf32>,
    %c1_i32_32 = arith.constant 1 : i32
    %73 = arith.index_cast %c1_i32_32 : i32 to index
    %c0_33 = arith.constant 0 : index
    %c0_34 = arith.constant 0 : index
    %74 = vector.load %arg1[%73, %c0_33, %c0_34] : memref<4x16x256xf32, #tpu.memory_space<vmem>>, vector<1x16x256xf32>
    %75 = vector.shape_cast %74 : vector<1x16x256xf32> to vector<16x256xf32>
    %76 = vector.broadcast %59 : vector<16x1xf32> to vector<16x256xf32>
    %77 = arith.mulf %75, %76 : vector<16x256xf32>
    %78 = vector.broadcast %61 : vector<16x1xf32> to vector<16x256xf32>
    %79 = arith.addf %77, %78 : vector<16x256xf32>
    %80 = arith.index_cast %c1_i32_32 : i32 to index
    %c0_35 = arith.constant 0 : index
    %c0_36 = arith.constant 0 : index
    %81 = vector.load %arg4[%80, %c0_35, %c0_36] : memref<4x16x256xf32, #tpu.memory_space<vmem>>, vector<1x16x256xf32>
    %82 = vector.shape_cast %81 : vector<1x16x256xf32> to vector<16x256xf32>
    %83 = vector.shape_cast %79 : vector<16x256xf32> to vector<1x16x256xf32>
    tpu.vector_store %arg4[%80, %c0_35, %c0_36], %83 {strides = array<i32>} : memref<4x16x256xf32, #tpu.memory_space<vmem>>, vector<1x16x256xf32>,
    %c2_i32_37 = arith.constant 2 : i32
    %84 = arith.index_cast %c2_i32_37 : i32 to index
    %c0_38 = arith.constant 0 : index
    %c0_39 = arith.constant 0 : index
    %85 = vector.load %arg1[%84, %c0_38, %c0_39] : memref<4x16x256xf32, #tpu.memory_space<vmem>>, vector<1x16x256xf32>
    %86 = vector.shape_cast %85 : vector<1x16x256xf32> to vector<16x256xf32>
    %87 = vector.broadcast %59 : vector<16x1xf32> to vector<16x256xf32>
    %88 = arith.mulf %86, %87 : vector<16x256xf32>
    %89 = vector.broadcast %61 : vector<16x1xf32> to vector<16x256xf32>
    %90 = arith.addf %88, %89 : vector<16x256xf32>
    %91 = arith.index_cast %c2_i32_37 : i32 to index
    %c0_40 = arith.constant 0 : index
    %c0_41 = arith.constant 0 : index
    %92 = vector.load %arg4[%91, %c0_40, %c0_41] : memref<4x16x256xf32, #tpu.memory_space<vmem>>, vector<1x16x256xf32>
    %93 = vector.shape_cast %92 : vector<1x16x256xf32> to vector<16x256xf32>
    %94 = vector.shape_cast %90 : vector<16x256xf32> to vector<1x16x256xf32>
    tpu.vector_store %arg4[%91, %c0_40, %c0_41], %94 {strides = array<i32>} : memref<4x16x256xf32, #tpu.memory_space<vmem>>, vector<1x16x256xf32>,
    %c3_i32_42 = arith.constant 3 : i32
    %95 = arith.index_cast %c3_i32_42 : i32 to index
    %c0_43 = arith.constant 0 : index
    %c0_44 = arith.constant 0 : index
    %96 = vector.load %arg1[%95, %c0_43, %c0_44] : memref<4x16x256xf32, #tpu.memory_space<vmem>>, vector<1x16x256xf32>
    %97 = vector.shape_cast %96 : vector<1x16x256xf32> to vector<16x256xf32>
    %98 = vector.broadcast %59 : vector<16x1xf32> to vector<16x256xf32>
    %99 = arith.mulf %97, %98 : vector<16x256xf32>
    %100 = vector.broadcast %61 : vector<16x1xf32> to vector<16x256xf32>
    %101 = arith.addf %99, %100 : vector<16x256xf32>
    %102 = arith.index_cast %c3_i32_42 : i32 to index
    %c0_45 = arith.constant 0 : index
    %c0_46 = arith.constant 0 : index
    %103 = vector.load %arg4[%102, %c0_45, %c0_46] : memref<4x16x256xf32, #tpu.memory_space<vmem>>, vector<1x16x256xf32>
    %104 = vector.shape_cast %103 : vector<1x16x256xf32> to vector<16x256xf32>
    %105 = vector.shape_cast %101 : vector<16x256xf32> to vector<1x16x256xf32>
    tpu.vector_store %arg4[%102, %c0_45, %c0_46], %105 {strides = array<i32>} : memref<4x16x256xf32, #tpu.memory_space<vmem>>, vector<1x16x256xf32>,
    %c4_i32_47 = arith.constant 4 : i32
    %cst_48 = arith.constant 0.000000e+00 : f32
    %106 = vector.broadcast %cst_48 : f32 to vector<16x256xf32>
    %c0_i32_49 = arith.constant 0 : i32
    %107 = arith.index_cast %c0_i32_49 : i32 to index
    %c0_50 = arith.constant 0 : index
    %c0_51 = arith.constant 0 : index
    %108 = vector.load %arg2[%107, %c0_50, %c0_51] : memref<4x16x256xf32, #tpu.memory_space<vmem>>, vector<1x16x256xf32>
    %109 = vector.shape_cast %108 : vector<1x16x256xf32> to vector<16x256xf32>
    %110 = arith.addf %106, %109 : vector<16x256xf32>
    %c1_i32_52 = arith.constant 1 : i32
    %111 = arith.index_cast %c1_i32_52 : i32 to index
    %c0_53 = arith.constant 0 : index
    %c0_54 = arith.constant 0 : index
    %112 = vector.load %arg2[%111, %c0_53, %c0_54] : memref<4x16x256xf32, #tpu.memory_space<vmem>>, vector<1x16x256xf32>
    %113 = vector.shape_cast %112 : vector<1x16x256xf32> to vector<16x256xf32>
    %114 = arith.addf %110, %113 : vector<16x256xf32>
    %c2_i32_55 = arith.constant 2 : i32
    %115 = arith.index_cast %c2_i32_55 : i32 to index
    %c0_56 = arith.constant 0 : index
    %c0_57 = arith.constant 0 : index
    %116 = vector.load %arg2[%115, %c0_56, %c0_57] : memref<4x16x256xf32, #tpu.memory_space<vmem>>, vector<1x16x256xf32>
    %117 = vector.shape_cast %116 : vector<1x16x256xf32> to vector<16x256xf32>
    %118 = arith.addf %114, %117 : vector<16x256xf32>
    %c3_i32_58 = arith.constant 3 : i32
    %119 = arith.index_cast %c3_i32_58 : i32 to index
    %c0_59 = arith.constant 0 : index
    %c0_60 = arith.constant 0 : index
    %120 = vector.load %arg2[%119, %c0_59, %c0_60] : memref<4x16x256xf32, #tpu.memory_space<vmem>>, vector<1x16x256xf32>
    %121 = vector.shape_cast %120 : vector<1x16x256xf32> to vector<16x256xf32>
    %122 = arith.addf %118, %121 : vector<16x256xf32>
    %c4_i32_61 = arith.constant 4 : i32
    %cst_62 = arith.constant dense<0.000000e+00> : vector<16xf32>
    %123 = vector.multi_reduction <add>, %122, %cst_62 [1] : vector<16x256xf32> to vector<16xf32>
    %124 = vector.shape_cast %123 : vector<16xf32> to vector<16x1xf32>
    %cst_63 = arith.constant 9.765625E-4 : f32
    %125 = vector.broadcast %cst_63 : f32 to vector<16x1xf32>
    %126 = arith.mulf %124, %125 : vector<16x1xf32>
    %c0_i32_64 = arith.constant 0 : i32
    %127 = arith.index_cast %c0_i32_64 : i32 to index
    %c0_65 = arith.constant 0 : index
    %c0_66 = arith.constant 0 : index
    %128 = vector.load %arg2[%127, %c0_65, %c0_66] : memref<4x16x256xf32, #tpu.memory_space<vmem>>, vector<1x16x256xf32>
    %129 = vector.shape_cast %128 : vector<1x16x256xf32> to vector<16x256xf32>
    %130 = vector.broadcast %126 : vector<16x1xf32> to vector<16x256xf32>
    %131 = arith.subf %129, %130 : vector<16x256xf32>
    %132 = arith.mulf %131, %131 : vector<16x256xf32>
    %133 = arith.addf %106, %132 : vector<16x256xf32>
    %c1_i32_67 = arith.constant 1 : i32
    %134 = arith.index_cast %c1_i32_67 : i32 to index
    %c0_68 = arith.constant 0 : index
    %c0_69 = arith.constant 0 : index
    %135 = vector.load %arg2[%134, %c0_68, %c0_69] : memref<4x16x256xf32, #tpu.memory_space<vmem>>, vector<1x16x256xf32>
    %136 = vector.shape_cast %135 : vector<1x16x256xf32> to vector<16x256xf32>
    %137 = vector.broadcast %126 : vector<16x1xf32> to vector<16x256xf32>
    %138 = arith.subf %136, %137 : vector<16x256xf32>
    %139 = arith.mulf %138, %138 : vector<16x256xf32>
    %140 = arith.addf %133, %139 : vector<16x256xf32>
    %c2_i32_70 = arith.constant 2 : i32
    %141 = arith.index_cast %c2_i32_70 : i32 to index
    %c0_71 = arith.constant 0 : index
    %c0_72 = arith.constant 0 : index
    %142 = vector.load %arg2[%141, %c0_71, %c0_72] : memref<4x16x256xf32, #tpu.memory_space<vmem>>, vector<1x16x256xf32>
    %143 = vector.shape_cast %142 : vector<1x16x256xf32> to vector<16x256xf32>
    %144 = vector.broadcast %126 : vector<16x1xf32> to vector<16x256xf32>
    %145 = arith.subf %143, %144 : vector<16x256xf32>
    %146 = arith.mulf %145, %145 : vector<16x256xf32>
    %147 = arith.addf %140, %146 : vector<16x256xf32>
    %c3_i32_73 = arith.constant 3 : i32
    %148 = arith.index_cast %c3_i32_73 : i32 to index
    %c0_74 = arith.constant 0 : index
    %c0_75 = arith.constant 0 : index
    %149 = vector.load %arg2[%148, %c0_74, %c0_75] : memref<4x16x256xf32, #tpu.memory_space<vmem>>, vector<1x16x256xf32>
    %150 = vector.shape_cast %149 : vector<1x16x256xf32> to vector<16x256xf32>
    %151 = vector.broadcast %126 : vector<16x1xf32> to vector<16x256xf32>
    %152 = arith.subf %150, %151 : vector<16x256xf32>
    %153 = arith.mulf %152, %152 : vector<16x256xf32>
    %154 = arith.addf %147, %153 : vector<16x256xf32>
    %c4_i32_76 = arith.constant 4 : i32
    %cst_77 = arith.constant dense<0.000000e+00> : vector<16xf32>
    %155 = vector.multi_reduction <add>, %154, %cst_77 [1] : vector<16x256xf32> to vector<16xf32>
    %156 = vector.shape_cast %155 : vector<16xf32> to vector<16x1xf32>
    %cst_78 = arith.constant 9.765625E-4 : f32
    %157 = vector.broadcast %cst_78 : f32 to vector<16x1xf32>
    %158 = arith.mulf %156, %157 : vector<16x1xf32>
    %cst_79 = arith.constant 9.99999974E-6 : f32
    %159 = vector.broadcast %cst_79 : f32 to vector<16x1xf32>
    %160 = arith.addf %158, %159 : vector<16x1xf32>
    %161 = math.rsqrt %160 : vector<16x1xf32>
    %162 = vector.extract_strided_slice %0 {offsets = [0, 2], sizes = [16, 1], strides = [1, 1]} : vector<16x4xf32> to vector<16x1xf32>
    %163 = vector.extract_strided_slice %0 {offsets = [0, 3], sizes = [16, 1], strides = [1, 1]} : vector<16x4xf32> to vector<16x1xf32>
    %164 = arith.mulf %161, %162 : vector<16x1xf32>
    %165 = arith.mulf %126, %164 : vector<16x1xf32>
    %166 = arith.subf %163, %165 : vector<16x1xf32>
    %c0_i32_80 = arith.constant 0 : i32
    %167 = arith.index_cast %c0_i32_80 : i32 to index
    %c0_81 = arith.constant 0 : index
    %c0_82 = arith.constant 0 : index
    %168 = vector.load %arg2[%167, %c0_81, %c0_82] : memref<4x16x256xf32, #tpu.memory_space<vmem>>, vector<1x16x256xf32>
    %169 = vector.shape_cast %168 : vector<1x16x256xf32> to vector<16x256xf32>
    %170 = vector.broadcast %164 : vector<16x1xf32> to vector<16x256xf32>
    %171 = arith.mulf %169, %170 : vector<16x256xf32>
    %172 = vector.broadcast %166 : vector<16x1xf32> to vector<16x256xf32>
    %173 = arith.addf %171, %172 : vector<16x256xf32>
    %174 = arith.index_cast %c0_i32_80 : i32 to index
    %c0_83 = arith.constant 0 : index
    %c0_84 = arith.constant 0 : index
    %175 = vector.load %arg5[%174, %c0_83, %c0_84] : memref<4x16x256xf32, #tpu.memory_space<vmem>>, vector<1x16x256xf32>
    %176 = vector.shape_cast %175 : vector<1x16x256xf32> to vector<16x256xf32>
    %177 = vector.shape_cast %173 : vector<16x256xf32> to vector<1x16x256xf32>
    tpu.vector_store %arg5[%174, %c0_83, %c0_84], %177 {strides = array<i32>} : memref<4x16x256xf32, #tpu.memory_space<vmem>>, vector<1x16x256xf32>,
    %c1_i32_85 = arith.constant 1 : i32
    %178 = arith.index_cast %c1_i32_85 : i32 to index
    %c0_86 = arith.constant 0 : index
    %c0_87 = arith.constant 0 : index
    %179 = vector.load %arg2[%178, %c0_86, %c0_87] : memref<4x16x256xf32, #tpu.memory_space<vmem>>, vector<1x16x256xf32>
    %180 = vector.shape_cast %179 : vector<1x16x256xf32> to vector<16x256xf32>
    %181 = vector.broadcast %164 : vector<16x1xf32> to vector<16x256xf32>
    %182 = arith.mulf %180, %181 : vector<16x256xf32>
    %183 = vector.broadcast %166 : vector<16x1xf32> to vector<16x256xf32>
    %184 = arith.addf %182, %183 : vector<16x256xf32>
    %185 = arith.index_cast %c1_i32_85 : i32 to index
    %c0_88 = arith.constant 0 : index
    %c0_89 = arith.constant 0 : index
    %186 = vector.load %arg5[%185, %c0_88, %c0_89] : memref<4x16x256xf32, #tpu.memory_space<vmem>>, vector<1x16x256xf32>
    %187 = vector.shape_cast %186 : vector<1x16x256xf32> to vector<16x256xf32>
    %188 = vector.shape_cast %184 : vector<16x256xf32> to vector<1x16x256xf32>
    tpu.vector_store %arg5[%185, %c0_88, %c0_89], %188 {strides = array<i32>} : memref<4x16x256xf32, #tpu.memory_space<vmem>>, vector<1x16x256xf32>,
    %c2_i32_90 = arith.constant 2 : i32
    %189 = arith.index_cast %c2_i32_90 : i32 to index
    %c0_91 = arith.constant 0 : index
    %c0_92 = arith.constant 0 : index
    %190 = vector.load %arg2[%189, %c0_91, %c0_92] : memref<4x16x256xf32, #tpu.memory_space<vmem>>, vector<1x16x256xf32>
    %191 = vector.shape_cast %190 : vector<1x16x256xf32> to vector<16x256xf32>
    %192 = vector.broadcast %164 : vector<16x1xf32> to vector<16x256xf32>
    %193 = arith.mulf %191, %192 : vector<16x256xf32>
    %194 = vector.broadcast %166 : vector<16x1xf32> to vector<16x256xf32>
    %195 = arith.addf %193, %194 : vector<16x256xf32>
    %196 = arith.index_cast %c2_i32_90 : i32 to index
    %c0_93 = arith.constant 0 : index
    %c0_94 = arith.constant 0 : index
    %197 = vector.load %arg5[%196, %c0_93, %c0_94] : memref<4x16x256xf32, #tpu.memory_space<vmem>>, vector<1x16x256xf32>
    %198 = vector.shape_cast %197 : vector<1x16x256xf32> to vector<16x256xf32>
    %199 = vector.shape_cast %195 : vector<16x256xf32> to vector<1x16x256xf32>
    tpu.vector_store %arg5[%196, %c0_93, %c0_94], %199 {strides = array<i32>} : memref<4x16x256xf32, #tpu.memory_space<vmem>>, vector<1x16x256xf32>,
    %c3_i32_95 = arith.constant 3 : i32
    %200 = arith.index_cast %c3_i32_95 : i32 to index
    %c0_96 = arith.constant 0 : index
    %c0_97 = arith.constant 0 : index
    %201 = vector.load %arg2[%200, %c0_96, %c0_97] : memref<4x16x256xf32, #tpu.memory_space<vmem>>, vector<1x16x256xf32>
    %202 = vector.shape_cast %201 : vector<1x16x256xf32> to vector<16x256xf32>
    %203 = vector.broadcast %164 : vector<16x1xf32> to vector<16x256xf32>
    %204 = arith.mulf %202, %203 : vector<16x256xf32>
    %205 = vector.broadcast %166 : vector<16x1xf32> to vector<16x256xf32>
    %206 = arith.addf %204, %205 : vector<16x256xf32>
    %207 = arith.index_cast %c3_i32_95 : i32 to index
    %c0_98 = arith.constant 0 : index
    %c0_99 = arith.constant 0 : index
    %208 = vector.load %arg5[%207, %c0_98, %c0_99] : memref<4x16x256xf32, #tpu.memory_space<vmem>>, vector<1x16x256xf32>
    %209 = vector.shape_cast %208 : vector<1x16x256xf32> to vector<16x256xf32>
    %210 = vector.shape_cast %206 : vector<16x256xf32> to vector<1x16x256xf32>
    tpu.vector_store %arg5[%207, %c0_98, %c0_99], %210 {strides = array<i32>} : memref<4x16x256xf32, #tpu.memory_space<vmem>>, vector<1x16x256xf32>,
    %c4_i32_100 = arith.constant 4 : i32
    return
  }
  func.func @transform_0(%arg0: i32) -> (i32, i32, i32) {
    %c0_i32 = arith.constant 0 : i32
    %c0_i32_0 = arith.constant 0 : i32
    %c0_i32_1 = arith.constant 0 : i32
    return %c0_i32, %arg0, %c0_i32_0 : i32, i32, i32
  }
  func.func @transform_1(%arg0: i32) -> (i32, i32, i32) {
    %c0_i32 = arith.constant 0 : i32
    %c0_i32_0 = arith.constant 0 : i32
    %c0_i32_1 = arith.constant 0 : i32
    return %c0_i32, %arg0, %c0_i32_0 : i32, i32, i32
  }
  func.func @transform_2(%arg0: i32) -> (i32, i32) {
    %c0_i32 = arith.constant 0 : i32
    %c0_i32_0 = arith.constant 0 : i32
    %c0_i32_1 = arith.constant 0 : i32
    return %c0_i32, %c0_i32_0 : i32, i32
  }
  func.func @transform_3(%arg0: i32) -> (i32, i32, i32) {
    %c0_i32 = arith.constant 0 : i32
    %c0_i32_0 = arith.constant 0 : i32
    %c0_i32_1 = arith.constant 0 : i32
    return %c0_i32, %arg0, %c0_i32_0 : i32, i32, i32
  }
  func.func @transform_4(%arg0: i32) -> (i32, i32, i32) {
    %c0_i32 = arith.constant 0 : i32
    %c0_i32_0 = arith.constant 0 : i32
    %c0_i32_1 = arith.constant 0 : i32
    return %c0_i32, %arg0, %c0_i32_0 : i32, i32, i32
  }
}

</mosaic_0001>

<bundles_post_ra>
// kernel: tpu_custom_call.1
= control target key start
LH: loop header
LB: loop body
LE: loop exit
PB: predicated region body
PF: predicated region fallthrough
CT: control target
= control target key end

     0   :  { %10 = vsyncpa [#allocation3], 0  ;;  %s883_s0 = inlined_call_operand.hbm [shape: f32[4,16,256], index: 0, kind: input, shape index: {}]   ;;  %s884_s1 = inlined_call_operand.hbm [shape: f32[4,16,256], index: 1, kind: input, shape index: {}]   ;;  %s885_s2 = inlined_call_operand.vmem [shape: f32[16,4], index: 2, kind: input, shape index: {}]   ;;  %s886_s3 = inlined_call_operand.hbm [shape: f32[4,16,256], index: 3, kind: output, shape index: {0}]   ;;  %s887_s4 = inlined_call_operand.hbm [shape: f32[4,16,256], index: 4, kind: output, shape index: {1}]  }
   0x1   :  { %11 = vsyncpa [#allocation6], 0 }
   0x2   :  { %12 = vsyncpa [#allocation4], 0 }
   0x3   :  { %13 = vsyncpa [#allocation9], 0  ;;  %s596_s15 = smov [#allocation2]  }
   0x4   :  { %s19_s16 = sshll.u32 %s596_s15, 4  ;;  %s20_s16 = int_to_ptr.vmem [resolvable:$true] %s19_s16 }
   0x5   :  { %s516_s17 = scalar_lea.vmem %s20_s16, 2048  ;;  %p521_p1 = scmp.lt.s32.totalorder %s20_s16, %s20_s16 }
   0x6   :  { %p517_p0 = scmp.ne.s32.totalorder %s20_s16, %s516_s17  ;;  %p522_p2 = scmp.lt.s32.totalorder %s516_s17, %s516_s17 }
   0x8   :  { %p523_p3 = por %p522_p2, %p521_p1 }
   0xa   :  { %p524_p4 = pnand %p523_p3, %p517_p0 }
   0xc   :  { %527 = shalt.err (!%p524_p4)
}
   0xd   :  { %s597_s18 = smov 256   ;;  %s598_s19 = smov 16  }
   0xe   :  { %25 = dma.hbm_to_vmem [thread:$0]  %s883_s0, 2048, %s20_s16, [#allocation3], %s597_s18, %s597_s18, %s598_s19  }
   0xf   :  { %s599_s22 = smov [#allocation5]  }
  0x10   :  { %s31_s23 = sshll.u32 %s599_s22, 4  ;;  %s32_s23 = int_to_ptr.vmem [resolvable:$true] %s31_s23 }
  0x11   :  { %s536_s24 = scalar_lea.vmem %s32_s23, 2048  ;;  %p541_p6 = scmp.lt.s32.totalorder %s32_s23, %s32_s23 }
  0x12   :  { %p537_p5 = scmp.ne.s32.totalorder %s32_s23, %s536_s24  ;;  %p542_p7 = scmp.lt.s32.totalorder %s536_s24, %s536_s24 }
  0x14   :  { %p543_p8 = por %p542_p7, %p541_p6 }
  0x16   :  { %p544_p9 = pnand %p543_p8, %p537_p5 }
  0x18   :  { %547 = shalt.err (!%p544_p9)
}
  0x19   :  { %37 = dma.hbm_to_vmem [thread:$0]  %s884_s1, 2048, %s32_s23, [#allocation6], %s597_s18, %s597_s18, %s598_s19  }
  0x1a   :  { %588 = dma.done.wait [#allocation3], 2048  }
  0x1b   :  { %589 = vsyncadd [#allocation3], 4294965248 }
  0x1c   :  { %590 = dma.done.wait [#allocation6], 2048  }
  0x1d   :  { %591 = vsyncadd [#allocation6], 4294965248  ;;  %v644_v0 = vld [vmem:[#allocation2] sm:$0xff]  ;;  %v646_v1 = vld [vmem:[#allocation2 + $0x8] sm:$0xff]  ;;  %s601_s27 = smov 1  }
  0x1e   :  { %v648_v2 = vld [vmem:[#allocation2 + $0x20] sm:$0xff]  ;;  %v650_v3 = vld [vmem:[#allocation2 + $0x28] sm:$0xff]  ;;  %v687_v23 = vld [vmem:[#allocation2 + $0x10] sm:$0xff] }
  0x1f   :  { %v61_v4 = vadd.f32 %v648_v2, %v644_v0  ;;  %v654_v5 = vld [vmem:[#allocation2 + $0x40] sm:$0xff]  ;;  %v656_v6 = vld [vmem:[#allocation2 + $0x48] sm:$0xff]  ;;  %v62_v7 = vadd.f32 %v650_v3, %v646_v1  ;;  %v689_v24 = vld [vmem:[#allocation2 + $0x18] sm:$0xff] }
  0x20   :  { %v660_v8 = vld [vmem:[#allocation2 + $0x60] sm:$0xff]  ;;  %v662_v9 = vld [vmem:[#allocation2 + $0x68] sm:$0xff]  ;;  %v694_v28 = vld [vmem:[#allocation2 + $0x30] sm:$0xff] }
  0x21   :  { %v664_v10 = vld [vmem:[#allocation5] sm:$0xff]  ;;  %v70_v11 = vadd.f32 %v654_v5, %v61_v4  ;;  %v667_v12 = vld [vmem:[#allocation5 + $0x8] sm:$0xff]  ;;  %v71_v15 = vadd.f32 %v656_v6, %v62_v7  ;;  %v696_v29 = vld [vmem:[#allocation2 + $0x38] sm:$0xff]  ;;  %v63_v31 = vadd.f32 %v694_v28, %v687_v23 }
  0x22   :  { %v669_v13 = vld [vmem:[#allocation5 + $0x20] sm:$0xff]  ;;  %v671_v14 = vld [vmem:[#allocation5 + $0x28] sm:$0xff]  ;;  %v698_v30 = vld [vmem:[#allocation2 + $0x50] sm:$0xff]  ;;  %v64_v32 = vadd.f32 %v696_v29, %v689_v24 }
  0x23   :  { %v261_v16 = vadd.f32 %v669_v13, %v664_v10  ;;  %v262_v17 = vadd.f32 %v671_v14, %v667_v12  ;;  %v678_v18 = vld [vmem:[#allocation5 + $0x40] sm:$0xff]  ;;  %v680_v19 = vld [vmem:[#allocation5 + $0x48] sm:$0xff]  ;;  %v79_v21 = vadd.f32 %v660_v8, %v70_v11  ;;  %v80_v25 = vadd.f32 %v662_v9, %v71_v15  ;;  %v704_v33 = vld [vmem:[#allocation2 + $0x58] sm:$0xff] }
  0x24   :  { %v682_v20 = vld [vmem:[#allocation5 + $0x60] sm:$0xff]  ;;  %v685_v22 = vld [vmem:[#allocation5 + $0x68] sm:$0xff]  ;;  %v706_v34 = vld [vmem:[#allocation2 + $0x70] sm:$0xff]  ;;  %v72_v42 = vadd.f32 %v698_v30, %v63_v31  ;;  %v73_v43 = vadd.f32 %v704_v33, %v64_v32 }
  0x25   :  { %v270_v26 = vadd.f32 %v678_v18, %v261_v16  ;;  %v271_v27 = vadd.f32 %v680_v19, %v262_v17  ;;  %v708_v35 = vld [vmem:[#allocation2 + $0x78] sm:$0xff]  ;;  %v83_v36 = vadd.f32 %v80_v25, %v79_v21  ;;  %v712_v39 = vld [vmem:[#allocation5 + $0x10] sm:$0xff] }
  0x26   :  { %v714_v40 = vld [vmem:[#allocation5 + $0x18] sm:$0xff]  ;;  %v716_v41 = vld [vmem:[#allocation5 + $0x30] sm:$0xff]  ;;  %v81_v51 = vadd.f32 %v706_v34, %v72_v42  ;;  %v82_v52 = vadd.f32 %v708_v35, %v73_v43 }
  0x27   :  { %v279_v37 = vadd.f32 %v682_v20, %v270_v26  ;;  %v280_v38 = vadd.f32 %v685_v22, %v271_v27  ;;  %v720_v44 = vld [vmem:[#allocation5 + $0x38] sm:$0xff]  ;;  %v263_v45 = vadd.f32 %v716_v41, %v712_v39  ;;  %v724_v46 = vld [vmem:[#allocation5 + $0x50] sm:$0xff]  ;;  %84 = vadd.xlane.f32.xlu0 %v83_v36 }
  0x28   :  { %v726_v47 = vld [vmem:[#allocation5 + $0x58] sm:$0xff]  ;;  %v264_v49 = vadd.f32 %v720_v44, %v714_v40  ;;  %v730_v50 = vld [vmem:[#allocation5 + $0x70] sm:$0xff]  ;;  %v86_v56 = vadd.f32 %v82_v52, %v81_v51 }
  0x29   :  { %v283_v48 = vadd.f32 %v280_v38, %v279_v37  ;;  %v272_v53 = vadd.f32 %v724_v46, %v263_v45  ;;  %v735_v54 = vld [vmem:[#allocation5 + $0x78] sm:$0xff] }
  0x2a   :  { %v273_v55 = vadd.f32 %v726_v47, %v264_v49 }
  0x2b   :  { %284 = vadd.xlane.f32.xlu1 %v283_v48  ;;  %v281_v57 = vadd.f32 %v730_v50, %v272_v53  ;;  %87 = vadd.xlane.f32.xlu0 %v86_v56 }
  0x2c   :  { %v282_v58 = vadd.f32 %v735_v54, %v273_v55 }
  0x2e   :  { %v286_v59 = vadd.f32 %v282_v58, %v281_v57 }
  0x30   :  { %287 = vadd.xlane.f32.xlu1 %v286_v59 }
  0xb0   :  { %v85_v60 = vpop.xlane.xlu0 %84 }
  0xb1   :  { %v740_v61 = vmul.f32 0.0009765625, %v85_v60 }
  0xb3   :  { %v91_v4 = vsub.f32 %v644_v0, %v740_v61  ;;  %v92_v7 = vsub.f32 %v646_v1, %v740_v61  ;;  %v103_v11 = vsub.f32 %v648_v2, %v740_v61  ;;  %v104_v15 = vsub.f32 %v650_v3, %v740_v61 }
  0xb4   :  { %v285_v62 = vpop.xlane.xlu1 %284  ;;  %v115_v16 = vsub.f32 %v654_v5, %v740_v61  ;;  %v116_v17 = vsub.f32 %v656_v6, %v740_v61  ;;  %v127_v21 = vsub.f32 %v660_v8, %v740_v61  ;;  %v88_v25 = vpop.xlane.xlu0 %87  ;;  %v128_v32 = vsub.f32 %v662_v9, %v740_v61 }
  0xb5   :  { %v742_v63 = vmul.f32 0.0009765625, %v285_v62  ;;  %v95_v26 = vmul.f32 %v91_v4, %v91_v4  ;;  %v96_v27 = vmul.f32 %v92_v7, %v92_v7  ;;  %v107_v31 = vmul.f32 %v103_v11, %v103_v11 }
  0xb6   :  { %v760_v36 = vmul.f32 0.0009765625, %v88_v25  ;;  %v108_v37 = vmul.f32 %v104_v15, %v104_v15  ;;  %v119_v38 = vmul.f32 %v115_v16, %v115_v16  ;;  %v120_v42 = vmul.f32 %v116_v17, %v116_v17 }
  0xb7   :  { %v111_v43 = vadd.f32 %v107_v31, %v95_v26  ;;  %v131_v45 = vmul.f32 %v127_v21, %v127_v21  ;;  %v132_v48 = vmul.f32 %v128_v32, %v128_v32  ;;  %v291_v49 = vsub.f32 %v664_v10, %v742_v63 }
  0xb8   :  { %v112_v52 = vadd.f32 %v108_v37, %v96_v27  ;;  %v292_v53 = vsub.f32 %v667_v12, %v742_v63  ;;  %v303_v55 = vsub.f32 %v669_v13, %v742_v63  ;;  %v304_v56 = vsub.f32 %v671_v14, %v742_v63 }
  0xb9   :  { %v288_v51 = vpop.xlane.xlu1 %287  ;;  %v123_v58 = vadd.f32 %v119_v38, %v111_v43  ;;  %v295_v59 = vmul.f32 %v291_v49, %v291_v49  ;;  %v315_v60 = vsub.f32 %v678_v18, %v742_v63  ;;  %v316_v16 = vsub.f32 %v680_v19, %v742_v63 }
  0xba   :  { %v770_v57 = vmul.f32 0.0009765625, %v288_v51  ;;  %v124_v62 = vadd.f32 %v120_v42, %v112_v52  ;;  %v296_v4 = vmul.f32 %v292_v53, %v292_v53  ;;  %v307_v7 = vmul.f32 %v303_v55, %v303_v55 }
  0xbb   :  { %v308_v11 = vmul.f32 %v304_v56, %v304_v56  ;;  %v135_v15 = vadd.f32 %v131_v45, %v123_v58  ;;  %v319_v17 = vmul.f32 %v315_v60, %v315_v60  ;;  %v327_v21 = vsub.f32 %v682_v20, %v742_v63 }
  0xbc   :  { %v136_v25 = vadd.f32 %v132_v48, %v124_v62  ;;  %v311_v26 = vadd.f32 %v307_v7, %v295_v59  ;;  %v328_v31 = vsub.f32 %v685_v22, %v742_v63  ;;  %v320_v32 = vmul.f32 %v316_v16, %v316_v16 }
  0xbd   :  { %v312_v27 = vadd.f32 %v308_v11, %v296_v4  ;;  %v331_v37 = vmul.f32 %v327_v21, %v327_v21  ;;  %v93_v38 = vsub.f32 %v687_v23, %v760_v36  ;;  %v94_v42 = vsub.f32 %v689_v24, %v760_v36 }
  0xbe   :  { %v139_v43 = vadd.f32 %v136_v25, %v135_v15  ;;  %v323_v45 = vadd.f32 %v319_v17, %v311_v26  ;;  %v332_v49 = vmul.f32 %v328_v31, %v328_v31  ;;  %v105_v51 = vsub.f32 %v694_v28, %v760_v36 }
  0xbf   :  { %v324_v48 = vadd.f32 %v320_v32, %v312_v27  ;;  %v97_v52 = vmul.f32 %v93_v38, %v93_v38  ;;  %v98_v53 = vmul.f32 %v94_v42, %v94_v42  ;;  %v106_v55 = vsub.f32 %v696_v29, %v760_v36 }
  0xc0   :  { %140 = vadd.xlane.f32.xlu0 %v139_v43  ;;  %v335_v56 = vadd.f32 %v331_v37, %v323_v45  ;;  %v109_v58 = vmul.f32 %v105_v51, %v105_v51  ;;  %v117_v59 = vsub.f32 %v698_v30, %v760_v36  ;;  %v118_v60 = vsub.f32 %v704_v33, %v760_v36 }
  0xc1   :  { %v336_v62 = vadd.f32 %v332_v49, %v324_v48  ;;  %v110_v4 = vmul.f32 %v106_v55, %v106_v55  ;;  %v129_v7 = vsub.f32 %v706_v34, %v760_v36  ;;  %v130_v11 = vsub.f32 %v708_v35, %v760_v36 }
  0xc2   :  { %v113_v15 = vadd.f32 %v109_v58, %v97_v52  ;;  %v121_v16 = vmul.f32 %v117_v59, %v117_v59  ;;  %v122_v17 = vmul.f32 %v118_v60, %v118_v60  ;;  %v293_v21 = vsub.f32 %v712_v39, %v770_v57 }
  0xc3   :  { %v339_v25 = vadd.f32 %v336_v62, %v335_v56  ;;  %v114_v26 = vadd.f32 %v110_v4, %v98_v53  ;;  %v133_v27 = vmul.f32 %v129_v7, %v129_v7  ;;  %v134_v31 = vmul.f32 %v130_v11, %v130_v11 }
  0xc4   :  { %v125_v32 = vadd.f32 %v121_v16, %v113_v15  ;;  %v294_v37 = vsub.f32 %v714_v40, %v770_v57  ;;  %v297_v38 = vmul.f32 %v293_v21, %v293_v21  ;;  %v305_v42 = vsub.f32 %v716_v41, %v770_v57 }
  0xc5   :  { %340 = vadd.xlane.f32.xlu0 %v339_v25  ;;  %v126_v43 = vadd.f32 %v122_v17, %v114_v26  ;;  %v306_v45 = vsub.f32 %v720_v44, %v770_v57  ;;  %v317_v49 = vsub.f32 %v724_v46, %v770_v57  ;;  %v318_v51 = vsub.f32 %v726_v47, %v770_v57 }
  0xc6   :  { %v137_v48 = vadd.f32 %v133_v27, %v125_v32  ;;  %v298_v52 = vmul.f32 %v294_v37, %v294_v37  ;;  %v309_v53 = vmul.f32 %v305_v42, %v305_v42  ;;  %v329_v55 = vsub.f32 %v730_v50, %v770_v57 }
  0xc7   :  { %v138_v56 = vadd.f32 %v134_v31, %v126_v43  ;;  %v310_v58 = vmul.f32 %v306_v45, %v306_v45  ;;  %v321_v59 = vmul.f32 %v317_v49, %v317_v49  ;;  %v322_v60 = vmul.f32 %v318_v51, %v318_v51 }
  0xc8   :  { %v313_v62 = vadd.f32 %v309_v53, %v297_v38  ;;  %v330_v4 = vsub.f32 %v735_v54, %v770_v57  ;;  %v333_v7 = vmul.f32 %v329_v55, %v329_v55  ;;  %v600_v32 = vmov 0  }
  0xc9   :  { %v142_v11 = vadd.f32 %v138_v56, %v137_v48  ;;  %v314_v15 = vadd.f32 %v310_v58, %v298_v52  ;;  %493 = vset.pattern.permute.xlu0 %v600_v32  ;;  %494 = vset.pattern.permute.xlu1 %v600_v32  ;;  %v46_v52 = vld [vmem:[%s885_s2] sm:$0xff]  ;;  %v604_v32 = vmov 1  }
  0xca   :  { %v325_v16 = vadd.f32 %v321_v59, %v313_v62  ;;  %v334_v17 = vmul.f32 %v330_v4, %v330_v4  ;;  %v47_v62 = vld [vmem:[%s885_s2 + $0x8] sm:$0xff]  ;;  %s605_s2 = smov [#allocation7]  }
  0xcb   :  { %143 = vadd.xlane.f32.xlu1 %v142_v11  ;;  %v326_v21 = vadd.f32 %v322_v60, %v314_v15  ;;  %v602_v15 = vmov 2   ;;  %s453_s30 = sshll.u32 %s605_s2, 4  ;;  %s840_s30 = int_to_ptr.vmem [resolvable:$true] %s453_s30 }
  0xcc   :  { %v337_v25 = vadd.f32 %v333_v7, %v325_v16  ;;  %s548_s5 = scalar_lea.vmem %s840_s30, 2048  ;;  %p553_p11 = scmp.lt.s32.totalorder %s840_s30, %s840_s30 }
  0xcd   :  { %v338_v26 = vadd.f32 %v334_v17, %v326_v21  ;;  %p549_p10 = scmp.ne.s32.totalorder %s840_s30, %s548_s5  ;;  %p554_p12 = scmp.lt.s32.totalorder %s548_s5, %s548_s5 }
  0xcf   :  { %v342_v27 = vadd.f32 %v338_v26, %v337_v25  ;;  %p555_p13 = por %p554_p12, %p553_p11 }
  0xd1   :  { %343 = vadd.xlane.f32.xlu1 %v342_v27  ;;  %v603_v27 = vmov 3   ;;  %p556_p0 = pnand %p555_p13, %p549_p10 }
 0x149   :  { %v141_v31 = vpop.xlane.xlu0 %140 }
 0x14a   :  { %v145_v37 = vmul.f32 0.0009765625, %v141_v31 }
 0x14c   :  { %v147_v38 = vadd.f32 1e-05, %v145_v37 }
 0x14e   :  { %500 = vrsqrt.f32 %v147_v38  ;;  %v341_v42 = vpop.xlane.xlu0 %340 }
 0x14f   :  { %v345_v43 = vmul.f32 0.0009765625, %v341_v42 }
 0x151   :  { %v347_v49 = vadd.f32 1e-05, %v345_v43 }
 0x153   :  { %502 = vrsqrt.f32 %v347_v49 }
 0x154   :  { %v144_v45 = vpop.xlane.xlu1 %143 }
 0x155   :  { %v146_v51 = vmul.f32 0.0009765625, %v144_v45 }
 0x157   :  { %v148_v48 = vadd.f32 1e-05, %v146_v51 }
 0x159   :  { %504 = vrsqrt.f32 %v148_v48 }
 0x15a   :  { %v344_v53 = vpop.xlane.xlu1 %343 }
 0x15b   :  { %v501_v55 = vpop.eup %500  ;;  %v346_v56 = vmul.f32 0.0009765625, %v344_v53 }
 0x15c   :  { %v151_v58 = vmul.f32 %v501_v55, %v46_v52 }
 0x15d   :  { %v348_v59 = vadd.f32 1e-05, %v346_v56 }
 0x15e   :  { %v153_v60 = vmul.f32 %v151_v58, %v740_v61 }
 0x15f   :  { %506 = vrsqrt.f32 %v348_v59 }
 0x160   :  { %157 = vrot.lane.b32.xlu0 %v153_v60, %s601_s27  ;;  %v503_v4 = vpop.eup %502 }
 0x161   :  { %v351_v17 = vmul.f32 %v503_v4, %v46_v52 }
 0x163   :  { %v353_v61 = vmul.f32 %v351_v17, %v742_v63 }
 0x164   :  { %167 = vperm.xlu0 %493, %v151_v58  }
 0x166   :  { %v505_v7 = vpop.eup %504 }
 0x167   :  { %v152_v11 = vmul.f32 %v505_v7, %v47_v62 }
 0x168   :  { %496 = vset.pattern.permute.xlu0 %v602_v15 }
 0x169   :  { %v154_v16 = vmul.f32 %v152_v11, %v760_v36 }
 0x16b   :  { %159 = vrot.lane.b32.xlu1 %v154_v16, %s601_s27 }
 0x16c   :  { %v507_v21 = vpop.eup %506 }
 0x16d   :  { %v352_v25 = vmul.f32 %v507_v21, %v47_v62 }
 0x16f   :  { %357 = vrot.lane.b32.xlu1 %v353_v61, %s601_s27  ;;  %372 = vperm.xlu0 %496, %v352_v25   ;;  %v354_v26 = vmul.f32 %v352_v25, %v770_v57 }
 0x173   :  { %359 = vrot.lane.b32.xlu1 %v354_v26, %s601_s27  ;;  %498 = vset.pattern.permute.xlu0 %v603_v27 }
 0x177   :  { %172 = vperm.xlu1 %494, %v152_v11  }
 0x17b   :  { %495 = vset.pattern.permute.xlu1 %v602_v15 }
 0x17c   :  { %367 = vperm.xlu1 %495, %v351_v17  }
 0x180   :  { %497 = vset.pattern.permute.xlu1 %v604_v32 }
 0x1d2   :  { %v158_v31 = vpop.permute.xlu0 %157 }
 0x1d3   :  { %v163_v36 = vsub.f32 %v46_v52, %v158_v31 }
 0x1d5   :  { %181 = vperm.xlu1 %497, %v163_v36  }
 0x1dd   :  { %v160_v37 = vpop.permute.xlu1 %159 }
 0x1de   :  { %v164_v38 = vsub.f32 %v47_v62, %v160_v37 }
 0x1df   :  { %v168_v49 = vpop.permute.xlu0 %167 }
 0x1e0   :  { %186 = vperm.xlu1 %497, %v164_v38   ;;  %v175_v48 = vmul.f32 %v168_v49, %v644_v0  ;;  %v176_v53 = vmul.f32 %v168_v49, %v646_v1  ;;  %v201_v55 = vmul.f32 %v168_v49, %v648_v2  ;;  %v202_v56 = vmul.f32 %v168_v49, %v650_v3 }
 0x1e1   :  { %v358_v63 = vpop.permute.xlu1 %357  ;;  %v218_v58 = vmul.f32 %v168_v49, %v654_v5  ;;  %v235_v59 = vmul.f32 %v168_v49, %v660_v8  ;;  %v236_v60 = vmul.f32 %v168_v49, %v662_v9 }
 0x1e2   :  { %v363_v42 = vsub.f32 %v46_v52, %v358_v63  ;;  %v219_v52 = vmul.f32 %v168_v49, %v656_v6 }
 0x1e4   :  { %381 = vperm.xlu0 %498, %v363_v42   ;;  %499 = vset.pattern.permute.xlu1 %v603_v27 }
 0x1e5   :  { %v360_v43 = vpop.permute.xlu1 %359 }
 0x1e6   :  { %v364_v57 = vsub.f32 %v47_v62, %v360_v43 }
 0x1e8   :  { %386 = vperm.xlu1 %499, %v364_v57  }
 0x1ea   :  { %v834_v8 = vpop.permute.xlu0 %372 }
 0x1f2   :  { %v173_v45 = vpop.permute.xlu1 %172 }
 0x1f3   :  { %v177_v2 = vmul.f32 %v173_v45, %v687_v23  ;;  %v178_v3 = vmul.f32 %v173_v45, %v689_v24  ;;  %v203_v5 = vmul.f32 %v173_v45, %v694_v28  ;;  %v204_v6 = vmul.f32 %v173_v45, %v696_v29 }
 0x1f4   :  { %v220_v9 = vmul.f32 %v173_v45, %v698_v30  ;;  %v221_v21 = vmul.f32 %v173_v45, %v704_v33  ;;  %v237_v61 = vmul.f32 %v173_v45, %v706_v34  ;;  %v238_v25 = vmul.f32 %v173_v45, %v708_v35 }
 0x1f7   :  { %v368_v51 = vpop.permute.xlu1 %367 }
 0x1f8   :  { %v375_v30 = vmul.f32 %v368_v51, %v664_v10  ;;  %v376_v33 = vmul.f32 %v368_v51, %v667_v12  ;;  %v401_v34 = vmul.f32 %v368_v51, %v669_v13  ;;  %v402_v35 = vmul.f32 %v368_v51, %v671_v14 }
 0x1f9   :  { %v418_v37 = vmul.f32 %v368_v51, %v678_v18  ;;  %v419_v38 = vmul.f32 %v368_v51, %v680_v19  ;;  %v435_v63 = vmul.f32 %v368_v51, %v682_v20  ;;  %v436_v10 = vmul.f32 %v368_v51, %v685_v22 }
 0x250   :  { %v182_v62 = vpop.permute.xlu1 %181 }
 0x251   :  { %v189_v4 = vadd.f32 %v182_v62, %v175_v48  ;;  %v190_v7 = vadd.f32 %v182_v62, %v176_v53  ;;  %v205_v11 = vadd.f32 %v201_v55, %v182_v62  ;;  %v206_v15 = vadd.f32 %v202_v56, %v182_v62 }
 0x252   :  { %v222_v0 = vadd.f32 %v218_v58, %v182_v62  ;;  %v223_v16 = vadd.f32 %v219_v52, %v182_v62  ;;  %v239_v1 = vadd.f32 %v235_v59, %v182_v62  ;;  %v240_v17 = vadd.f32 %v236_v60, %v182_v62 }
 0x253   :  { %193 = vst [vmem:[#allocation7] sm:$0xff] %v189_v4  ;;  %194 = vst [vmem:[#allocation7 + $0x8] sm:$0xff] %v190_v7 }
 0x254   :  { %210 = vst [vmem:[#allocation7 + $0x20] sm:$0xff] %v205_v11  ;;  %211 = vst [vmem:[#allocation7 + $0x28] sm:$0xff] %v206_v15 }
 0x255   :  { %227 = vst [vmem:[#allocation7 + $0x40] sm:$0xff] %v222_v0  ;;  %228 = vst [vmem:[#allocation7 + $0x48] sm:$0xff] %v223_v16 }
 0x256   :  { %244 = vst [vmem:[#allocation7 + $0x60] sm:$0xff] %v239_v1  ;;  %245 = vst [vmem:[#allocation7 + $0x68] sm:$0xff] %v240_v17 }
 0x25b   :  { %v187_v26 = vpop.permute.xlu1 %186 }
 0x25c   :  { %v191_v23 = vadd.f32 %v187_v26, %v177_v2  ;;  %v192_v27 = vadd.f32 %v187_v26, %v178_v3  ;;  %v207_v24 = vadd.f32 %v203_v5, %v187_v26  ;;  %v208_v32 = vadd.f32 %v204_v6, %v187_v26 }
 0x25d   :  { %v224_v28 = vadd.f32 %v220_v9, %v187_v26  ;;  %v225_v31 = vadd.f32 %v221_v21, %v187_v26  ;;  %v241_v29 = vadd.f32 %v237_v61, %v187_v26  ;;  %v242_v36 = vadd.f32 %v238_v25, %v187_v26 }
 0x25e   :  { %195 = vst [vmem:[#allocation7 + $0x10] sm:$0xff] %v191_v23  ;;  %196 = vst [vmem:[#allocation7 + $0x18] sm:$0xff] %v192_v27 }
 0x25f   :  { %212 = vst [vmem:[#allocation7 + $0x30] sm:$0xff] %v207_v24  ;;  %213 = vst [vmem:[#allocation7 + $0x38] sm:$0xff] %v208_v32  ;;  %v382_v12 = vpop.permute.xlu0 %381 }
 0x260   :  { %229 = vst [vmem:[#allocation7 + $0x50] sm:$0xff] %v224_v28  ;;  %230 = vst [vmem:[#allocation7 + $0x58] sm:$0xff] %v225_v31  ;;  %v389_v42 = vadd.f32 %v382_v12, %v375_v30  ;;  %v390_v43 = vadd.f32 %v382_v12, %v376_v33  ;;  %v405_v13 = vadd.f32 %v401_v34, %v382_v12 }
 0x261   :  { %246 = vst [vmem:[#allocation7 + $0x70] sm:$0xff] %v241_v29  ;;  %247 = vst [vmem:[#allocation7 + $0x78] sm:$0xff] %v242_v36  ;;  %v406_v57 = vadd.f32 %v402_v35, %v382_v12 }
 0x262   :  { %559 = shalt.err (!%p556_p0)
}
 0x263   :  { %459 = dma.vmem_to_hbm [thread:$0]  %s840_s30, 2048, %s886_s3, [#allocation4], %s597_s18, %s597_s18, %s598_s19   ;;  %v422_v14 = vadd.f32 %v418_v37, %v382_v12  ;;  %v423_v18 = vadd.f32 %v419_v38, %v382_v12  ;;  %v439_v19 = vadd.f32 %v435_v63, %v382_v12  ;;  %v440_v20 = vadd.f32 %v436_v10, %v382_v12  ;;  %393 = vst [vmem:[#allocation8] sm:$0xff] %v389_v42  ;;  %v387_v48 = vpop.permute.xlu1 %386 }
 0x264   :  { %394 = vst [vmem:[#allocation8 + $0x8] sm:$0xff] %v390_v43  ;;  %410 = vst [vmem:[#allocation8 + $0x20] sm:$0xff] %v405_v13  ;;  %v377_v22 = vmul.f32 %v834_v8, %v712_v39  ;;  %v378_v45 = vmul.f32 %v834_v8, %v714_v40  ;;  %v403_v49 = vmul.f32 %v834_v8, %v716_v41  ;;  %s606_s3 = smov [#allocation8]  }
 0x265   :  { %411 = vst [vmem:[#allocation8 + $0x28] sm:$0xff] %v406_v57  ;;  %v404_v51 = vmul.f32 %v834_v8, %v720_v44  ;;  %s465_s8 = sshll.u32 %s606_s3, 4  ;;  %427 = vst [vmem:[#allocation8 + $0x40] sm:$0xff] %v422_v14  ;;  %v420_v53 = vmul.f32 %v834_v8, %v724_v46  ;;  %v421_v39 = vmul.f32 %v834_v8, %v726_v47  ;;  %s466_s8 = int_to_ptr.vmem [resolvable:$true] %s465_s8 }
 0x266   :  { %428 = vst [vmem:[#allocation8 + $0x48] sm:$0xff] %v423_v18  ;;  %444 = vst [vmem:[#allocation8 + $0x60] sm:$0xff] %v439_v19  ;;  %v437_v40 = vmul.f32 %v834_v8, %v730_v50  ;;  %v438_v41 = vmul.f32 %v834_v8, %v735_v54  ;;  %v391_v44 = vadd.f32 %v387_v48, %v377_v22  ;;  %s568_s9 = scalar_lea.vmem %s466_s8, 2048  ;;  %p573_p2 = scmp.lt.s32.totalorder %s466_s8, %s466_s8 }
 0x267   :  { %445 = vst [vmem:[#allocation8 + $0x68] sm:$0xff] %v440_v20  ;;  %v392_v55 = vadd.f32 %v387_v48, %v378_v45  ;;  %v407_v56 = vadd.f32 %v403_v49, %v387_v48  ;;  %v408_v58 = vadd.f32 %v404_v51, %v387_v48  ;;  %v424_v52 = vadd.f32 %v420_v53, %v387_v48  ;;  %p569_p1 = scmp.ne.s32.totalorder %s466_s8, %s568_s9  ;;  %p574_p3 = scmp.lt.s32.totalorder %s568_s9, %s568_s9 }
 0x268   :  { %v425_v59 = vadd.f32 %v421_v39, %v387_v48  ;;  %v441_v60 = vadd.f32 %v437_v40, %v387_v48  ;;  %v442_v62 = vadd.f32 %v438_v41, %v387_v48  ;;  %395 = vst [vmem:[#allocation8 + $0x10] sm:$0xff] %v391_v44 }
 0x269   :  { %396 = vst [vmem:[#allocation8 + $0x18] sm:$0xff] %v392_v55  ;;  %412 = vst [vmem:[#allocation8 + $0x30] sm:$0xff] %v407_v56  ;;  %p575_p4 = por %p574_p3, %p573_p2 }
 0x26a   :  { %413 = vst [vmem:[#allocation8 + $0x38] sm:$0xff] %v408_v58  ;;  %429 = vst [vmem:[#allocation8 + $0x50] sm:$0xff] %v424_v52 }
 0x26b   :  { %430 = vst [vmem:[#allocation8 + $0x58] sm:$0xff] %v425_v59  ;;  %446 = vst [vmem:[#allocation8 + $0x70] sm:$0xff] %v441_v60  ;;  %p576_p5 = pnand %p575_p4, %p569_p1 }
 0x26c   :  { %447 = vst [vmem:[#allocation8 + $0x78] sm:$0xff] %v442_v62 }
 0x26d   :  { %579 = shalt.err (!%p576_p5)
}
 0x26e   :  { %471 = dma.vmem_to_hbm [thread:$0]  %s466_s8, 2048, %s887_s4, [#allocation9], %s597_s18, %s597_s18, %s598_s19  }
 0x26f   :  { %592 = dma.done.wait [#allocation4], 2048  }
 0x270   :  { %593 = vsyncadd [#allocation4], 4294965248 }
 0x271   :  { %594 = dma.done.wait [#allocation9], 2048  }
 0x272   :  { %595 = vsyncadd [#allocation9], 4294965248 }
 0x273   :  { %478 = vsyncpa [#allocation3], 1 }
 0x274   :  { %479 = vsyncpa [#allocation6], 1 }
 0x275   :  { %480 = vsyncpa [#allocation4], 1 }
 0x276   :  { %481 = vsyncpa [#allocation9], 1 }

</bundles_post_ra>
